<compile_context>
chip_gen: v5e
topology: v5e:2x2
jax: 0.10.0
libtpu: 0.0.40
codegen_flags: <defaults>
</compile_context>

<pallas_src>
import jax
import jax.numpy as jnp
from jax.experimental import pallas as pl
from jax.experimental.pallas import tpu as pltpu


def _sescale_kernel(x_ref, w1_ref, b1_ref, w2_ref, b2_ref, o_ref):
    x = x_ref[...]                                       # (tile_n, ch_k), x.dtype
    # fc1 + relu: x stays in native dtype; MXU accumulates in f32.
    h = jnp.dot(x, w1_ref[...], preferred_element_type=jnp.float32) + b1_ref[...]
    h = jnp.maximum(h, 0.0)
    # fc2 + sigmoid: match the matmul operand dtype (no-op for f32 inputs);
    # sigmoid lands on the EUP slot (effectively free).
    h = h.astype(w2_ref.dtype)
    s = jnp.dot(h, w2_ref[...], preferred_element_type=jnp.float32) + b2_ref[...]
    s = jax.nn.sigmoid(s)
    # Gate in x.dtype: avoids materializing a full-tile f32 copy of x.
    o_ref[...] = (s.astype(x.dtype) * x).astype(o_ref.dtype)


def _vmem_plan():
    """(tile-plan byte budget, vmem_limit_bytes or None), per TPU generation."""
    kind = ""
    try:
        kind = jax.devices()[0].device_kind.lower()
    except Exception:
        pass
    mib = 1024 * 1024
    if "v7" in kind or "7x" in kind:
        # v7x: only 64 MiB physical VMEM -> keep the whole plan well under ~48 MiB.
        return 32 * mib, 48 * mib
    if "v6" in kind:
        # v6e: 32 MiB scoped default, 128 MiB physical -> bigger tiles, raised limit.
        return 40 * mib, 64 * mib
    if "v5e" in kind or "v5 lite" in kind or "v5lite" in kind:
        # v5e: tightest scoped default (16 MiB) but 128 MiB physical -> raise it.
        return 24 * mib, 48 * mib
    # Unknown generation: stay safely under the tightest scoped default.
    return 12 * mib, None


def _pick_tile_n(n, ch_k, r_k, itemsize, plan_bytes):
    lane = 128
    ch_pad = -(-ch_k // lane) * lane          # lane dim padded to 128 in VMEM
    r_pad = -(-r_k // lane) * lane
    sub = {4: 8, 2: 16, 1: 32}.get(itemsize, 8)
    # Per tile row the plan holds (all with the lane dim padded):
    #   4 pipeline buffers of x/out in x.dtype (2 streams, double-buffered)
    #   ~3 full-tile f32 temporaries inside the kernel (s, cast, gated product)
    #   ~2 f32 copies of h (pre/post ReLU) of width r_pad
    bytes_per_row = ch_pad * (4 * itemsize + 3 * 4) + r_pad * 2 * 4
    max_rows = max(plan_bytes // bytes_per_row, sub)
    tile = min(n, max_rows)
    if tile < n:
        tile = max((tile // sub) * sub, sub)  # sublane-aligned partial tiles
    return int(tile)


def se_scale(x, w1, b1, w2, b2, *, tile_n=None):
    """SEScale forward.

    x: (..., ch).  PyTorch-layout params: w1 (r, ch), b1 (r,), w2 (ch, r), b2 (ch,).
    If `tile_n` is given it refers to rows of the (possibly lane-folded) 2-D view.
    """
    orig_shape = x.shape
    ch = x.shape[-1]
    r = w1.shape[0]
    dtype = x.dtype
    itemsize = jnp.dtype(dtype).itemsize

    x2d = x.reshape(-1, ch)
    n = x2d.shape[0]

    # Weight prep (tiny, plain-JAX glue). Matmul operands stay in x.dtype;
    # biases stay f32 (added to the f32 accumulators).
    w1_t = w1.T.astype(dtype)                      # (ch, r)
    w2_t = w2.T.astype(dtype)                      # (r, ch)
    b1_2d = b1.reshape(1, r).astype(jnp.float32)   # (1, r)
    b2_2d = b2.reshape(1, ch).astype(jnp.float32)  # (1, ch)

    # Lane-dense folding for small channel counts.
    fold = 1
    if ch < 128 and 128 % ch == 0 and n % (128 // ch) == 0:
        fold = 128 // ch
    if fold > 1:
        eye = jnp.eye(fold, dtype=dtype)
        w1_k = jnp.kron(eye, w1_t)                 # (fold*ch=128, fold*r) block-diag
        w2_k = jnp.kron(eye, w2_t)                 # (fold*r, fold*ch=128) block-diag
        b1_k = jnp.tile(b1_2d, (1, fold))          # (1, fold*r)
        b2_k = jnp.tile(b2_2d, (1, fold))          # (1, 128)
        x_k = x2d.reshape(n // fold, fold * ch)    # row-major reshape: free
    else:
        w1_k, w2_k, b1_k, b2_k, x_k = w1_t, w2_t, b1_2d, b2_2d, x2d

    n_k, ch_k = x_k.shape
    r_k = w1_k.shape[1]

    plan_bytes, vmem_limit = _vmem_plan()
    if tile_n is None:
        tile_n = _pick_tile_n(n_k, ch_k, r_k, itemsize, plan_bytes)
    grid = (pl.cdiv(n_k, tile_n),)

    # HBM-bound: read + write x once; weights are noise. FLOPs = 2 matmuls.
    weight_bytes = int((w1.size + w2.size + b1.size + b2.size) * itemsize)
    cost = pl.CostEstimate(
        flops=int(4 * n * ch * r),
        transcendentals=int(n * ch),
        bytes_accessed=int(2 * n * ch * itemsize) + weight_bytes,
    )

    out = pl.pallas_call(
        _sescale_kernel,
        out_shape=jax.ShapeDtypeStruct((n_k, ch_k), dtype),
        grid=grid,
        in_specs=[
            pl.BlockSpec((tile_n, ch_k), lambda i: (i, 0)),   # x: streamed row tiles
            pl.BlockSpec((ch_k, r_k), lambda i: (0, 0)),      # weights/bias: resident
            pl.BlockSpec((1, r_k), lambda i: (0, 0)),
            pl.BlockSpec((r_k, ch_k), lambda i: (0, 0)),
            pl.BlockSpec((1, ch_k), lambda i: (0, 0)),
        ],
        out_specs=pl.BlockSpec((tile_n, ch_k), lambda i: (i, 0)),
        compiler_params=pltpu.CompilerParams(
            # Row tiles are independent -> megacore/dual-TC shardable; neutral elsewhere.
            dimension_semantics=("parallel",),
            vmem_limit_bytes=vmem_limit,
        ),
        cost_estimate=cost,
    )(x_k, w1_k, b1_k, w2_k, b2_k)

    return out.reshape(orig_shape)


def _reference(x, w1, b1, w2, b2):
    h = jax.nn.relu(x @ w1.T + b1)
    return jax.nn.sigmoid(h @ w2.T + b2) * x


if __name__ == "__main__":
    # Small shapes consistent with the module: batch=2, seq=8, hidden(ch)=32, r=8.
    batch, seq, ch, r = 2, 8, 32, 8

    key = jax.random.PRNGKey(0)
    kx, kw1, kb1, kw2, kb2 = jax.random.split(key, 5)

    x = jax.random.normal(kx, (batch, seq, ch), dtype=jnp.float32)

    # Deterministic parameter init (same shapes as nn.Linear(ch, r) / nn.Linear(r, ch)).
    bound1 = 1.0 / (ch ** 0.5)
    w1 = jax.random.uniform(kw1, (r, ch), minval=-bound1, maxval=bound1, dtype=jnp.float32)
    b1 = jax.random.uniform(kb1, (r,), minval=-bound1, maxval=bound1, dtype=jnp.float32)
    bound2 = 1.0 / (r ** 0.5)
    w2 = jax.random.uniform(kw2, (ch, r), minval=-bound2, maxval=bound2, dtype=jnp.float32)
    b2 = jax.random.uniform(kb2, (ch,), minval=-bound2, maxval=bound2, dtype=jnp.float32)

    # 1) Default path (ch=32 -> lane-dense fold of 4 rows, auto tile).
    out = se_scale(x, w1, b1, w2, b2)
    jax.block_until_ready(out)
    ref = _reference(x, w1, b1, w2, b2)
    assert jnp.allclose(out, ref, atol=1e-5, rtol=1e-5), "mismatch vs reference (auto tile)"

    # 2) Ragged tiled path: N=60 rows -> 15 folded rows with a forced 8-row
    #    tile (last block partially out of bounds -> masked writes).
    x_big = jax.random.normal(jax.random.PRNGKey(1), (3, 20, ch), dtype=jnp.float32)
    out_big = se_scale(x_big, w1, b1, w2, b2, tile_n=8)
    jax.block_until_ready(out_big)
    ref_big = _reference(x_big, w1, b1, w2, b2)
    assert jnp.allclose(out_big, ref_big, atol=1e-5, rtol=1e-5), "mismatch vs reference (tiled)"

    # 3) Non-folded fallback path (ch >= 128): exercises the plain layout.
    ch2, r2 = 256, 16
    k2 = jax.random.split(jax.random.PRNGKey(2), 5)
    x2 = jax.random.normal(k2[0], (2, 8, ch2), dtype=jnp.float32)
    b1a = 1.0 / (ch2 ** 0.5)
    w1b = jax.random.uniform(k2[1], (r2, ch2), minval=-b1a, maxval=b1a, dtype=jnp.float32)
    b1b = jax.random.uniform(k2[2], (r2,), minval=-b1a, maxval=b1a, dtype=jnp.float32)
    b2a = 1.0 / (r2 ** 0.5)
    w2b = jax.random.uniform(k2[3], (ch2, r2), minval=-b2a, maxval=b2a, dtype=jnp.float32)
    b2b = jax.random.uniform(k2[4], (ch2,), minval=-b2a, maxval=b2a, dtype=jnp.float32)
    out2 = se_scale(x2, w1b, b1b, w2b, b2b)
    jax.block_until_ready(out2)
    ref2 = _reference(x2, w1b, b1b, w2b, b2b)
    assert jnp.allclose(out2, ref2, atol=1e-5, rtol=1e-5), "mismatch vs reference (ch>=128)"

    print("KERNEL_OK")
</pallas_src>

<mosaic_0001>
module attributes {stable_mosaic.version = 11 : i64} {
  func.func @_sescale_kernel(%arg0: i32, %arg1: memref<4x128xf32, #tpu.memory_space<vmem>>, %arg2: memref<128x32xf32, #tpu.memory_space<vmem>>, %arg3: memref<1x32xf32, #tpu.memory_space<vmem>>, %arg4: memref<32x128xf32, #tpu.memory_space<vmem>>, %arg5: memref<1x128xf32, #tpu.memory_space<vmem>>, %arg6: memref<4x128xf32, #tpu.memory_space<vmem>>) attributes {dimension_semantics = [#tpu.dimension_semantics<parallel>], iteration_bounds = array<i64: 1>, scalar_prefetch = 0 : i64, scratch_operands = 0 : i64, tpu.core_type = #tpu.core_type<tc>, window_params = [{transform_indices = @transform_0, window_bounds = array<i64: 4, 128>}, {pipeline_mode = #tpu.pipeline_mode<synchronous>, transform_indices = @transform_1, window_bounds = array<i64: 128, 32>}, {pipeline_mode = #tpu.pipeline_mode<synchronous>, transform_indices = @transform_2, window_bounds = array<i64: 1, 32>}, {pipeline_mode = #tpu.pipeline_mode<synchronous>, transform_indices = @transform_3, window_bounds = array<i64: 32, 128>}, {pipeline_mode = #tpu.pipeline_mode<synchronous>, transform_indices = @transform_4, window_bounds = array<i64: 1, 128>}, {transform_indices = @transform_5, window_bounds = array<i64: 4, 128>}]} {
    %c0 = arith.constant 0 : index
    %c0_0 = arith.constant 0 : index
    %0 = vector.load %arg1[%c0, %c0_0] : memref<4x128xf32, #tpu.memory_space<vmem>>, vector<4x128xf32>
    %c0_1 = arith.constant 0 : index
    %c0_2 = arith.constant 0 : index
    %1 = vector.load %arg2[%c0_1, %c0_2] : memref<128x32xf32, #tpu.memory_space<vmem>>, vector<128x32xf32>
    %cst = arith.constant dense<0.000000e+00> : vector<4x32xf32>
    %2 = tpu.matmul %0, %1, %cst {dimension_numbers = #tpu.dot_dimension_numbers<[1], [0], [0], [1], [0, 0, 1, 1], [], []>} : vector<4x128xf32>, vector<128x32xf32>, vector<4x32xf32> -> vector<4x32xf32>
    %c0_3 = arith.constant 0 : index
    %c0_4 = arith.constant 0 : index
    %3 = vector.load %arg3[%c0_3, %c0_4] : memref<1x32xf32, #tpu.memory_space<vmem>>, vector<1x32xf32>
    %4 = vector.broadcast %3 : vector<1x32xf32> to vector<4x32xf32>
    %5 = arith.addf %2, %4 : vector<4x32xf32>
    %cst_5 = arith.constant 0.000000e+00 : f32
    %6 = vector.broadcast %cst_5 : f32 to vector<4x32xf32>
    %7 = arith.maximumf %5, %6 : vector<4x32xf32>
    %c0_6 = arith.constant 0 : index
    %c0_7 = arith.constant 0 : index
    %8 = vector.load %arg4[%c0_6, %c0_7] : memref<32x128xf32, #tpu.memory_space<vmem>>, vector<32x128xf32>
    %cst_8 = arith.constant dense<0.000000e+00> : vector<4x128xf32>
    %9 = tpu.matmul %7, %8, %cst_8 {dimension_numbers = #tpu.dot_dimension_numbers<[1], [0], [0], [1], [0, 0, 1, 1], [], []>} : vector<4x32xf32>, vector<32x128xf32>, vector<4x128xf32> -> vector<4x128xf32>
    %c0_9 = arith.constant 0 : index
    %c0_10 = arith.constant 0 : index
    %10 = vector.load %arg5[%c0_9, %c0_10] : memref<1x128xf32, #tpu.memory_space<vmem>>, vector<1x128xf32>
    %11 = vector.broadcast %10 : vector<1x128xf32> to vector<4x128xf32>
    %12 = arith.addf %9, %11 : vector<4x128xf32>
    %13 = arith.negf %12 : vector<4x128xf32>
    %14 = math.exp %13 : vector<4x128xf32>
    %cst_11 = arith.constant 1.000000e+00 : f32
    %15 = vector.broadcast %cst_11 : f32 to vector<4x128xf32>
    %16 = arith.addf %15, %14 : vector<4x128xf32>
    %17 = arith.divf %15, %16 : vector<4x128xf32>
    %18 = arith.mulf %17, %0 : vector<4x128xf32>
    %c0_12 = arith.constant 0 : index
    %c0_13 = arith.constant 0 : index
    %19 = vector.load %arg6[%c0_12, %c0_13] : memref<4x128xf32, #tpu.memory_space<vmem>>, vector<4x128xf32>
    tpu.vector_store %arg6[%c0_12, %c0_13], %18 {strides = array<i32>} : memref<4x128xf32, #tpu.memory_space<vmem>>, vector<4x128xf32>,
    return
  }
  func.func @transform_0(%arg0: i32) -> (i32, i32) {
    %c0_i32 = arith.constant 0 : i32
    %c0_i32_0 = arith.constant 0 : i32
    return %arg0, %c0_i32 : i32, i32
  }
  func.func @transform_1(%arg0: i32) -> (i32, i32) {
    %c0_i32 = arith.constant 0 : i32
    %c0_i32_0 = arith.constant 0 : i32
    %c0_i32_1 = arith.constant 0 : i32
    return %c0_i32, %c0_i32_0 : i32, i32
  }
  func.func @transform_2(%arg0: i32) -> (i32, i32) {
    %c0_i32 = arith.constant 0 : i32
    %c0_i32_0 = arith.constant 0 : i32
    %c0_i32_1 = arith.constant 0 : i32
    return %c0_i32, %c0_i32_0 : i32, i32
  }
  func.func @transform_3(%arg0: i32) -> (i32, i32) {
    %c0_i32 = arith.constant 0 : i32
    %c0_i32_0 = arith.constant 0 : i32
    %c0_i32_1 = arith.constant 0 : i32
    return %c0_i32, %c0_i32_0 : i32, i32
  }
  func.func @transform_4(%arg0: i32) -> (i32, i32) {
    %c0_i32 = arith.constant 0 : i32
    %c0_i32_0 = arith.constant 0 : i32
    %c0_i32_1 = arith.constant 0 : i32
    return %c0_i32, %c0_i32_0 : i32, i32
  }
  func.func @transform_5(%arg0: i32) -> (i32, i32) {
    %c0_i32 = arith.constant 0 : i32
    %c0_i32_0 = arith.constant 0 : i32
    return %arg0, %c0_i32 : i32, i32
  }
}

</mosaic_0001>

<bundles_post_ra>
// kernel: tpu_custom_call.1
= control target key start
LH: loop header
LB: loop body
LE: loop exit
PB: predicated region body
PF: predicated region fallthrough
CT: control target
= control target key end

     0   :  { %s270_s0 = inlined_call_operand.vmem [shape: f32[4,128], index: 0, kind: input, shape index: {}]   ;;  %s271_s1 = inlined_call_operand.vmem [shape: f32[128,32], index: 1, kind: input, shape index: {}]   ;;  %s272_s2 = inlined_call_operand.vmem [shape: f32[1,32], index: 2, kind: input, shape index: {}]   ;;  %s273_s3 = inlined_call_operand.vmem [shape: f32[32,128], index: 3, kind: input, shape index: {}]   ;;  %s274_s4 = inlined_call_operand.vmem [shape: f32[1,128], index: 4, kind: input, shape index: {}]   ;;  %s275_s5 = inlined_call_operand.hbm [shape: f32[4,128], index: 5, kind: output, shape index: {}]  }
   0x1   :  { %v37_v0 = vld [vmem:[%s271_s1 + $0x78] sm:$0xff]  ;;  %v36_v1 = vld [vmem:[%s271_s1 + $0x70] sm:$0xff]  ;;  %v35_v2 = vld [vmem:[%s271_s1 + $0x68] sm:$0xff] }
   0x2   :  { %42 = vmatpush.msra.mxu0 %v37_v0  ;;  %v34_v3 = vld [vmem:[%s271_s1 + $0x60] sm:$0xff]  ;;  %v66_v4 = vld [vmem:[%s273_s3 + $0x18] sm:$0xff] }
   0x3   :  { %v33_v5 = vld [vmem:[%s271_s1 + $0x58] sm:$0xff]  ;;  %87 = vmatpush.msra.mxu1 %v66_v4 }
   0x4   :  { %43 = vmatpush.msra.mxu0 %v36_v1 }
   0x6   :  { %44 = vmatpush.msra.mxu0 %v35_v2 }
   0x8   :  { %45 = vmatpush.msra.mxu0 %v34_v3 }
   0x9   :  { %10 = vsyncpa [#allocation3], 0  ;;  %v32_v6 = vld [vmem:[%s271_s1 + $0x50] sm:$0xff]  ;;  %v31_v7 = vld [vmem:[%s271_s1 + $0x48] sm:$0xff]  ;;  %vm71_vm0 = vcmask 261120   ;;  %s123_s13 = sshll.u32 %s275_s5, 4  ;;  %s124_s13 = int_to_ptr.hbm [resolvable:$true] %s123_s13 }
   0xa   :  { %46 = vmatpush.msra.mxu0 %v33_v5  ;;  %v30_v8 = vld [vmem:[%s271_s1 + $0x40] sm:$0xff]  ;;  %v29_v9 = vld [vmem:[%s271_s1 + $0x38] sm:$0xff]  ;;  %v28_v10 = vld [vmem:[%s271_s1 + $0x30] sm:$0xff] }
   0xb   :  { %v27_v11 = vld [vmem:[%s271_s1 + $0x28] sm:$0xff]  ;;  %v26_v12 = vld [vmem:[%s271_s1 + $0x20] sm:$0xff]  ;;  %v25_v13 = vld [vmem:[%s271_s1 + $0x18] sm:$0xff] }
   0xc   :  { %47 = vmatpush.msra.mxu0 %v32_v6  ;;  %v24_v14 = vld [vmem:[%s271_s1 + $0x10] sm:$0xff]  ;;  %v23_v15 = vld [vmem:[%s271_s1 + $0x8] sm:$0xff]  ;;  %v22_v16 = vld [vmem:[%s271_s1] sm:$0xff] }
   0xd   :  { %v21_v17 = vld [vmem:[%s270_s0] sm:$0xf]  ;;  %v65_v18 = vld [vmem:[%s273_s3 + $0x10] sm:$0xff]  ;;  %v64_v19 = vld [vmem:[%s273_s3 + $0x8] sm:$0xff] }
   0xe   :  { %48 = vmatpush.msra.mxu0 %v31_v7  ;;  %88 = vmatpush.msra.mxu1 %v65_v18  ;;  %v63_v20 = vld [vmem:[%s273_s3] sm:$0xff] }
   0xf   :  { %v135_v21 = vld [vmem:[%s272_s2] ss:$0 sm:$0xff]  ;;  %s167_s2 = smov [#allocation2]  }
  0x10   :  { %49 = vmatpush.msra.mxu0 %v30_v8  ;;  %89 = vmatpush.msra.mxu1 %v64_v19  ;;  %v136_v25 = vld [vmem:[%s274_s4] ss:$0 sm:$0xff]  ;;  %s121_s3 = sshll.u32 %s167_s2, 4  ;;  %s122_s3 = int_to_ptr.vmem [resolvable:$true] %s121_s3 }
  0x12   :  { %50 = vmatpush.msra.mxu0 %v29_v9  ;;  %90 = vmatpush.msra.mxu1 %v63_v20 }
  0x14   :  { %51 = vmatpush.msra.mxu0 %v28_v10 }
  0x16   :  { %52 = vmatpush.msra.mxu0 %v27_v11 }
  0x18   :  { %53 = vmatpush.msra.mxu0 %v26_v12 }
  0x1a   :  { %54 = vmatpush.msra.mxu0 %v25_v13 }
  0x1c   :  { %55 = vmatpush.msra.mxu0 %v24_v14 }
  0x1e   :  { %56 = vmatpush.msra.mxu0 %v23_v15 }
  0x20   :  { %57 = vmatpush.msra.mxu0 %v22_v16 }
  0x21   :  { %58 = vmatmul.f32.vlgmr.msra.gmra.mxu0 %v21_v17 }
  0x9e   :  { %v59_v22 = vpop.f32.mrf.mxu0 }
  0x9f   :  { %v60_v23 = vadd.f32 %v135_v21, %v59_v22 }
  0xa1   :  { %v62_v24 = vmax.f32 %v60_v23, 0.0 }
  0xa3   :  { %132 = vmatmul.msk.f32.vlgmr.msra.gmra.mxu1 %vm71_vm0, %v62_v24 }
 0x120   :  { %v92_v26 = vpop.f32.mrf.mxu1 }
 0x121   :  { %v93_v27 = vadd.f32 %v136_v25, %v92_v26 }
 0x123   :  { %v133_v28 = vmul.f32 -1.442695, %v93_v27 }
 0x125   :  { %137 = vpow2.f32 %v133_v28 }
 0x12b   :  { %v138_v29 = vpop.eup %137 }
 0x12c   :  { %v98_v30 = vadd.f32 1.0, %v138_v29 }
 0x12e   :  { %139 = vrcp.f32 %v98_v30  ;;  %v110_v34 = vand.u32 2147483648, %v98_v30  ;;  %v108_v36 = vand.u32 2147483647, %v98_v30  ;;  %vm104_vm2 = vweird.f32 %v98_v30 }
 0x130   :  { %v111_v38 = vor.u32 1.1754944e-38, %v110_v34  ;;  %vm109_vm4 = vcmp.eq.f32.partialorder %v108_v36, 8.507059e+37 }
 0x134   :  { %v140_v31 = vpop.eup %139 }
 0x135   :  { %v100_v32 = vmul.f32 %v140_v31, %v98_v30  ;;  %vm105_vm1 = vweird.f32 %v140_v31 }
 0x136   :  { %vm106_vm3 = vmor %vm104_vm2, %vm105_vm1 }
 0x137   :  { %v101_v33 = vsub.f32 1.0, %v100_v32 }
 0x139   :  { %v102_v35 = vmul.f32 %v140_v31, %v101_v33 }
 0x13b   :  { %v103_v37 = vadd.f32 %v140_v31, %v102_v35 }
 0x13d   :  { %v107_v39 = vsel %vm106_vm3, %v140_v31, %v103_v37 }
 0x13e   :  { %v112_v40 = vsel %vm109_vm4, %v111_v38, %v107_v39 }
 0x13f   :  { %v114_v41 = vmul.f32 %v112_v40, %v21_v17 }
 0x141   :  { %115 = vst [vmem:[#allocation2] sm:$0xf] %v114_v41 }
 0x142   :  { %126 = dma.vmem_to_hbm [thread:$0]  %s122_s3, 64, %s124_s13, [#allocation3]  }
 0x143   :  { %165 = dma.done.wait [#allocation3], 64  }
 0x144   :  { %166 = vsyncadd [#allocation3], 4294967232 }
 0x145   :  { %131 = vsyncpa [#allocation3], 1 }

</bundles_post_ra>
